<compile_context>
chip_gen: v7x
topology: tpu7x:2x2x1
jax: 0.10.0
libtpu: 0.0.40
codegen_flags: <defaults>
</compile_context>

<pallas_src>
import jax
import jax.numpy as jnp
from jax.experimental import pallas as pl
from jax.experimental.pallas import tpu as pltpu


def _normalize_kernel(x_ref, scale_ref, bias_ref, o_ref):
    # x_ref / o_ref: (block_rows, tile_hw) in the input dtype.
    # scale_ref / bias_ref: (block_rows, 1) float32, resident across the HW
    # grid axis (their index_map ignores j); lane-broadcast is in-kernel VPU
    # work hidden under the DMA of the data blocks.
    x = x_ref[...].astype(jnp.float32)
    o_ref[...] = (x * scale_ref[...] + bias_ref[...]).astype(o_ref.dtype)


def _largest_dividing_tile(total, unit, cap):
    """Largest multiple of `unit` that divides `total` and is <= cap, else 0."""
    start = cap - (cap % unit)
    for t in range(start, unit - 1, -unit):
        if total % t == 0:
            return t
    return 0


def _target_block_bytes():
    # ~8 MiB blocks everywhere except v5e (where 4 MiB already hides all
    # per-step overhead at ~820 GB/s and bigger blocks just burn VMEM).
    try:
        kind = jax.devices()[0].device_kind.lower()
    except Exception:
        return 4 * 1024 * 1024
    if "v5 lite" in kind or "v5e" in kind or "v5lite" in kind:
        return 4 * 1024 * 1024
    return 8 * 1024 * 1024


def normalize_by_channel_mean_std(x, mean, std, *, donate_input=False):
    """x: (N, C, H, W); mean, std: (C,). Returns (x - mean) / std with channel broadcast."""
    N, C, H, W = x.shape
    NC, HW = N * C, H * W
    itemsize = jnp.dtype(x.dtype).itemsize

    x2d = x.reshape(NC, HW)

    # Fold mean/std into scale/bias once, on the tiny C-length vectors, and
    # KEEP THEM IN float32 so low-precision inputs don't round 1/std, -mean/std:
    #   (x - mean) / std == x * (1/std) + (-mean/std)
    # Note: for pathological std == 0 this yields NaN (x*inf - inf) instead of
    # the reference's +-inf; acceptable for real normalization stats.
    std_f32 = std.astype(jnp.float32)
    mean_f32 = mean.astype(jnp.float32)
    scale_c = 1.0 / std_f32
    bias_c = -(mean_f32 / std_f32)
    # Per-row (per (n, c) plane) stats, shape (NC, 1): row n*C + c -> channel c.
    scale_rows = jnp.tile(scale_c, (N,)).reshape(NC, 1)
    bias_rows = jnp.tile(bias_c, (N,)).reshape(NC, 1)

    # ---- tile selection ------------------------------------------------------
    # Sublane packing: 8 rows for f32, 16 for bf16, 32 for int8/fp8.
    sublane = max(8, 32 // itemsize)
    TARGET_BLOCK_BYTES = _target_block_bytes()
    # Lane-axis cap; multiple of 128 keeps stores lane-dense and unmasked.
    MAX_TILE_HW = 8192 if TARGET_BLOCK_BYTES <= 4 * 1024 * 1024 else 16384

    # Lane-axis tile: full HW when it fits (full extent is always legal).
    # Otherwise prefer the largest multiple of 128 that evenly divides HW so
    # there is no masked partial j-tile; fall back to the flat cap.
    if HW <= MAX_TILE_HW:
        tile_hw = HW
    else:
        tile_hw = _largest_dividing_tile(HW, 128, MAX_TILE_HW) or MAX_TILE_HW

    # Row tile: largest multiple of `sublane` fitting the per-block budget,
    # preferring a divisor of NC to avoid a masked tail row-block.
    rows_budget = max(
        sublane,
        (TARGET_BLOCK_BYTES // (tile_hw * itemsize)) // sublane * sublane,
    )
    if NC <= rows_budget:
        block_rows = NC
    else:
        block_rows = _largest_dividing_tile(NC, sublane, rows_budget) or rows_budget

    grid = (pl.cdiv(NC, block_rows), pl.cdiv(HW, tile_hw))

    out2d = pl.pallas_call(
        _normalize_kernel,
        out_shape=jax.ShapeDtypeStruct((NC, HW), x.dtype),
        grid_spec=pltpu.PrefetchScalarGridSpec(
            num_scalar_prefetch=0,
            grid=grid,
            in_specs=[
                pl.BlockSpec((block_rows, tile_hw), lambda i, j: (i, j)),
                # Stats: index_map ignores j -> DMA'd once per row block and
                # reused (revisit-skip) across the whole HW axis.
                pl.BlockSpec((block_rows, 1), lambda i, j: (i, 0)),
                pl.BlockSpec((block_rows, 1), lambda i, j: (i, 0)),
            ],
            out_specs=pl.BlockSpec((block_rows, tile_hw), lambda i, j: (i, j)),
        ),
        compiler_params=pltpu.CompilerParams(
            # Row axis parallel (shards across v7x's two TCs, each with its own
            # resident stats); HW axis kept as the inner sequential loop.
            dimension_semantics=("parallel", "arbitrary"),
            # Above v5e's 16 MiB default scoped limit, below v7x's 64 MiB
            # physical; 8 MiB blocks double-buffered in+out ~= 32 MiB.
            vmem_limit_bytes=48 * 1024 * 1024,
        ),
        cost_estimate=pl.CostEstimate(
            flops=2 * NC * HW,
            bytes_accessed=2 * NC * HW * itemsize,
            transcendentals=0,
        ),
        # Pure stream: aliasing x -> out halves the HBM footprint when the
        # caller donates x; off by default so x stays readable afterwards.
        input_output_aliases=({0: 0} if donate_input else {}),
    )(x2d, scale_rows, bias_rows)

    return out2d.reshape(N, C, H, W)


if __name__ == "__main__":
    key = jax.random.PRNGKey(0)
    N, C, H, W = 2, 4, 16, 16

    k_x, _ = jax.random.split(key)
    x = jax.random.normal(k_x, (N, C, H, W), dtype=jnp.float32)

    # Deterministic per-channel stats (CIFAR-style values, synthetic).
    mean = jnp.array([0.4914, 0.4822, 0.4465, 0.5000], dtype=jnp.float32)
    std = jnp.array([0.2471, 0.2435, 0.2616, 0.2500], dtype=jnp.float32)

    out = normalize_by_channel_mean_std(x, mean, std)
    out = jax.block_until_ready(out)

    # Reference check against plain JAX broadcasting (same math as PyTorch).
    ref = (x - mean[None, :, None, None]) / std[None, :, None, None]
    assert out.shape == (N, C, H, W)
    # scale/bias refactor differs from sub-then-div by ~1 ulp; 1e-5 is ample.
    assert jnp.allclose(out, ref, atol=1e-5, rtol=1e-5)

    print("KERNEL_OK")
</pallas_src>

<mosaic_0001>
module attributes {stable_mosaic.version = 11 : i64} {
  func.func @_normalize_kernel(%arg0: i32, %arg1: i32, %arg2: memref<8x256xf32, #tpu.memory_space<vmem>>, %arg3: memref<8x1xf32, #tpu.memory_space<vmem>>, %arg4: memref<8x1xf32, #tpu.memory_space<vmem>>, %arg5: memref<8x256xf32, #tpu.memory_space<vmem>>) attributes {dimension_semantics = [#tpu.dimension_semantics<parallel>, #tpu.dimension_semantics<arbitrary>], iteration_bounds = array<i64: 1, 1>, scalar_prefetch = 0 : i64, scratch_operands = 0 : i64, tpu.core_type = #tpu.core_type<tc>, window_params = [{transform_indices = @transform_0, window_bounds = array<i64: 8, 256>}, {transform_indices = @transform_1, window_bounds = array<i64: 8, 1>}, {transform_indices = @transform_2, window_bounds = array<i64: 8, 1>}, {transform_indices = @transform_3, window_bounds = array<i64: 8, 256>}]} {
    %c0 = arith.constant 0 : index
    %c0_0 = arith.constant 0 : index
    %0 = vector.load %arg2[%c0, %c0_0] : memref<8x256xf32, #tpu.memory_space<vmem>>, vector<8x256xf32>
    %c0_1 = arith.constant 0 : index
    %c0_2 = arith.constant 0 : index
    %1 = vector.load %arg3[%c0_1, %c0_2] : memref<8x1xf32, #tpu.memory_space<vmem>>, vector<8x1xf32>
    %2 = vector.broadcast %1 : vector<8x1xf32> to vector<8x256xf32>
    %3 = arith.mulf %0, %2 : vector<8x256xf32>
    %c0_3 = arith.constant 0 : index
    %c0_4 = arith.constant 0 : index
    %4 = vector.load %arg4[%c0_3, %c0_4] : memref<8x1xf32, #tpu.memory_space<vmem>>, vector<8x1xf32>
    %5 = vector.broadcast %4 : vector<8x1xf32> to vector<8x256xf32>
    %6 = arith.addf %3, %5 : vector<8x256xf32>
    %c0_5 = arith.constant 0 : index
    %c0_6 = arith.constant 0 : index
    %7 = vector.load %arg5[%c0_5, %c0_6] : memref<8x256xf32, #tpu.memory_space<vmem>>, vector<8x256xf32>
    tpu.vector_store %arg5[%c0_5, %c0_6], %6 {strides = array<i32>} : memref<8x256xf32, #tpu.memory_space<vmem>>, vector<8x256xf32>,
    return
  }
  func.func @transform_0(%arg0: i32, %arg1: i32) -> (i32, i32) {
    %c0_i32 = arith.constant 0 : i32
    return %arg0, %arg1 : i32, i32
  }
  func.func @transform_1(%arg0: i32, %arg1: i32) -> (i32, i32) {
    %c0_i32 = arith.constant 0 : i32
    %c0_i32_0 = arith.constant 0 : i32
    return %arg0, %c0_i32 : i32, i32
  }
  func.func @transform_2(%arg0: i32, %arg1: i32) -> (i32, i32) {
    %c0_i32 = arith.constant 0 : i32
    %c0_i32_0 = arith.constant 0 : i32
    return %arg0, %c0_i32 : i32, i32
  }
  func.func @transform_3(%arg0: i32, %arg1: i32) -> (i32, i32) {
    %c0_i32 = arith.constant 0 : i32
    return %arg0, %arg1 : i32, i32
  }
}

</mosaic_0001>

<bundles_post_ra>
// kernel: tpu_custom_call.1
= control target key start
LH: loop header
LB: loop body
LE: loop exit
PB: predicated region body
PF: predicated region fallthrough
CT: control target
= control target key end

     0   :  { %s122_s0 = inlined_call_operand.vmem [shape: f32[8,256], index: 0, kind: input, shape index: {}]   ;;  %s123_s1 = inlined_call_operand.vmem [shape: f32[8,1], index: 1, kind: input, shape index: {}]   ;;  %s124_s2 = inlined_call_operand.vmem [shape: f32[8,1], index: 2, kind: input, shape index: {}]   ;;  %s125_s3 = inlined_call_operand.hbm [shape: f32[8,256], index: 3, kind: output, shape index: {}]  }
   0x1   :  { %v17_v0 = vld [vmem:[%s123_s1] sm:$0xff] }
   0x2   :  { %8 = vsyncpa [#allocation3], 0  ;;  %v76_v1 = vmov 0   ;;  %v25_v2 = vld [vmem:[%s124_s2] sm:$0xff]  ;;  %v16_v5 = vld [vmem:[%s122_s0 + $0x8] sm:$0xff]  ;;  %s77_s20 = smov [#allocation2]  }
   0x3   :  { %51 = vset.pattern.permute.xlu0 %v76_v1  ;;  %v15_v4 = vld [vmem:[%s122_s0] sm:$0xff]  ;;  %s41_s1 = sshll.u32 %s77_s20, 4  ;;  %s42_s1 = int_to_ptr.vmem [resolvable:$true] %s41_s1 }
   0x4   :  { %20 = vperm.xlu0 %51, %v17_v0   ;;  %s52_s2 = scalar_lea.vmem %s42_s1, 256  ;;  %p57_p1 = scmp.lt.s32.totalorder %s42_s1, %s42_s1 }
   0x5   :  { %p53_p0 = scmp.ne.s32.totalorder %s42_s1, %s52_s2  ;;  %p58_p2 = scmp.lt.s32.totalorder %s52_s2, %s52_s2 }
   0x7   :  { %p59_p3 = por %p58_p2, %p57_p1 }
   0x8   :  { %28 = vperm.xlu0 %51, %v25_v2  }
   0x9   :  { %p60_p4 = pnand %p59_p3, %p53_p0 }
  0x83   :  { %v21_v3 = vpop.permute.xlu0 %20 }
  0x84   :  { %v23_v6 = vmul.f32 %v21_v3, %v15_v4  ;;  %v24_v7 = vmul.f32 %v21_v3, %v16_v5 }
  0x87   :  { %v29_v8 = vpop.permute.xlu0 %28 }
  0x88   :  { %v31_v9 = vadd.f32 %v29_v8, %v23_v6  ;;  %v32_v10 = vadd.f32 %v29_v8, %v24_v7 }
  0x8a   :  { %33 = vst [vmem:[#allocation2] sm:$0xff] %v31_v9  ;;  %34 = vst [vmem:[#allocation2 + $0x8] sm:$0xff] %v32_v10 }
  0x8b   :  { %63 = shalt.err (!%p60_p4)
}
  0x8c   :  { %s64_s0 = scalar_lea.hbm %s125_s3, 256 }
  0x8d   :  { %p65_p5 = scmp.ne.s32.totalorder %s125_s3, %s64_s0  ;;  %p68_p6 = scmp.lt.u32.totalorder %s64_s0, %s125_s3 }
  0x8f   :  { %p70_p7 = pnand %p68_p6, %p65_p5 }
  0x91   :  { %73 = shalt.err (!%p70_p7)
}
  0x92   :  { %44 = dma.vmem_to_hbm [thread:$0]  %s42_s1, 256, %s125_s3, [#allocation3]  }
  0x93   :  { %74 = dma.done.wait [#allocation3], 256  }
  0x94   :  { %75 = vsyncadd [#allocation3], 4294967040 }
  0x95   :  { %48 = vsyncpa [#allocation3], 1 }

</bundles_post_ra>
